<compile_context>
chip_gen: v7x
topology: tpu7x:2x2x1
jax: 0.10.0
libtpu: 0.0.40
codegen_flags: <defaults>
</compile_context>

<pallas_src>
import functools

import jax
import jax.numpy as jnp
from jax.experimental import pallas as pl
from jax.experimental.pallas import tpu as pltpu


def _round_up(x, m):
    return (x + m - 1) // m * m


def _lstm_layer_kernel(x_ref, wih_ref, whh_ref, b_ref,
                       h_seq_ref, c_n_ref,
                       gx_sc, h_sc, c_sc,
                       *, hidden_size, time_block, n_pad, unroll):
    """One grid step == one block of `time_block` timesteps of this layer.

    x_ref     : (TB, Npad, I)   time-block of inputs
    wih_ref   : (I, 4H)         input->gates weight (pre-transposed)
    whh_ref   : (H, 4H)         hidden->gates weight (pre-transposed)
    b_ref     : (1, 4H)         combined bias (b_ih + b_hh)
    h_seq_ref : (TB, Npad, H)   h_t for every timestep of the block
    c_n_ref   : (Npad, H)       final cell state (block-invariant output)
    gx_sc     : (TB, Npad, 4H)  VMEM scratch for the hoisted x-projection
    h_sc,c_sc : (Npad, H)       VMEM scratch carrying state across blocks
    """
    blk = pl.program_id(0)

    @pl.when(blk == 0)
    def _():
        # hxcx defaults to zeros in LSTMx.forward_x
        h_sc[...] = jnp.zeros_like(h_sc)
        c_sc[...] = jnp.zeros_like(c_sc)

    H = hidden_size
    TB = time_block

    # Hoisted input projection + bias for the whole time block: one
    # MXU-efficient matmul instead of TB tiny (Npad, I) matmuls.
    # Npad is a multiple of 8, so the (TB, Npad, I) -> (TB*Npad, I) reshape
    # is layout-preserving.
    x_blk = x_ref[...].reshape(TB * n_pad, x_ref.shape[-1])
    gx = jnp.dot(x_blk, wih_ref[...], preferred_element_type=jnp.float32)
    gx = gx + b_ref[...]
    gx_sc[...] = gx.reshape(TB, n_pad, 4 * H)

    whh = whh_ref[...]

    def step(t, carry):
        h, c = carry
        gates = gx_sc[t] + jnp.dot(h, whh, preferred_element_type=jnp.float32)
        i_g = jax.nn.sigmoid(gates[:, 0 * H:1 * H])
        f_g = jax.nn.sigmoid(gates[:, 1 * H:2 * H])
        g_g = jnp.tanh(gates[:, 2 * H:3 * H])
        o_g = jax.nn.sigmoid(gates[:, 3 * H:4 * H])
        c = f_g * c + i_g * g_g
        h = o_g * jnp.tanh(c)
        h_seq_ref[t] = h.astype(h_seq_ref.dtype)
        return (h, c)

    h_f, c_f = jax.lax.fori_loop(0, TB, step, (h_sc[...], c_sc[...]),
                                 unroll=unroll)

    # Carry state to the next time block; emit final cell state (the output
    # block is grid-invariant, so the last write is what reaches HBM).
    h_sc[...] = h_f
    c_sc[...] = c_f
    c_n_ref[...] = c_f.astype(c_n_ref.dtype)


def lstm_layer_pallas(x_seq, w_ih_t, w_hh_t, bias_row, *, time_block_cap=128):
    """Run one LSTM layer over the full (already batch-padded) sequence.

    x_seq    : (L, Npad, I)
    w_ih_t   : (I, 4H)
    w_hh_t   : (H, 4H)
    bias_row : (1, 4H)
    returns  : h_seq (L, Npad, H), c_n (Npad, H)
    """
    L, Np, I = x_seq.shape
    H = w_hh_t.shape[0]

    # Largest divisor of L not exceeding the cap: amortizes per-grid-step
    # overhead while keeping the (TB, Npad, *) blocks well inside VMEM.
    tb = 1
    for d in range(1, min(L, time_block_cap) + 1):
        if L % d == 0:
            tb = d
    nb = L // tb
    unroll = tb <= 32

    kernel = functools.partial(_lstm_layer_kernel, hidden_size=H,
                               time_block=tb, n_pad=Np, unroll=unroll)
    return pl.pallas_call(
        kernel,
        out_shape=(jax.ShapeDtypeStruct((L, Np, H), x_seq.dtype),
                   jax.ShapeDtypeStruct((Np, H), x_seq.dtype)),
        grid_spec=pltpu.PrefetchScalarGridSpec(
            num_scalar_prefetch=0,
            grid=(nb,),
            in_specs=[
                pl.BlockSpec((tb, Np, I), lambda b: (b, 0, 0)),
                pl.BlockSpec((I, 4 * H), lambda b: (0, 0)),
                pl.BlockSpec((H, 4 * H), lambda b: (0, 0)),
                pl.BlockSpec((1, 4 * H), lambda b: (0, 0)),
            ],
            out_specs=[
                pl.BlockSpec((tb, Np, H), lambda b: (b, 0, 0)),
                pl.BlockSpec((Np, H), lambda b: (0, 0)),
            ],
            scratch_shapes=[
                pltpu.VMEM((tb, Np, 4 * H), jnp.float32),
                pltpu.VMEM((Np, H), jnp.float32),
                pltpu.VMEM((Np, H), jnp.float32),
            ],
        ),
        compiler_params=pltpu.CompilerParams(
            dimension_semantics=("arbitrary",)),  # recurrence over time
    )(x_seq, w_ih_t, w_hh_t, bias_row)


def lstmx_forward(x, params):
    """Pallas implementation of LSTMx.forward(x) with hxcx=None, full_ret=None.

    x      : (L, N, H_in)            (batch_first=False)
    params : list of per-layer dicts with keys 'w_ih', 'w_hh', 'b_ih', 'b_hh'
             (torch LSTMCell layouts: w_ih (4H, in), w_hh (4H, H), b (4H,))
    returns: (output, (h_n, c_n))
             output : (L, N, H)
             h_n    : (num_layers, N, H)
             c_n    : (num_layers, N, H)
    """
    L, N, _ = x.shape
    n_pad = _round_up(N, 8)  # f32 sublane quantum
    seq = x if n_pad == N else jnp.pad(x, ((0, 0), (0, n_pad - N), (0, 0)))

    h_last, c_last = [], []
    for p in params:
        w_ih_t = p['w_ih'].T                       # (in, 4H)
        w_hh_t = p['w_hh'].T                       # (H, 4H)
        b = (p['b_ih'] + p['b_hh'])[None, :]       # (1, 4H)
        h_seq, c_n = lstm_layer_pallas(seq, w_ih_t, w_hh_t, b)
        seq = h_seq
        h_last.append(h_seq[-1])
        c_last.append(c_n)

    out = seq[:, :N, :]
    h_n = jnp.stack(h_last)[:, :N, :]              # (num_layers, N, H)
    c_n = jnp.stack(c_last)[:, :N, :]
    return out, (h_n, c_n)


def lstmx_reference(x, params):
    """Pure-JAX reference (lax.scan) for correctness checking."""
    seq = x
    h_last, c_last = [], []
    for p in params:
        w_ih_t, w_hh_t = p['w_ih'].T, p['w_hh'].T
        b = p['b_ih'] + p['b_hh']
        H = p['w_hh'].shape[1]
        N = x.shape[1]

        def step(carry, x_t):
            h, c = carry
            g = x_t @ w_ih_t + h @ w_hh_t + b
            i = jax.nn.sigmoid(g[:, 0 * H:1 * H])
            f = jax.nn.sigmoid(g[:, 1 * H:2 * H])
            gg = jnp.tanh(g[:, 2 * H:3 * H])
            o = jax.nn.sigmoid(g[:, 3 * H:4 * H])
            c = f * c + i * gg
            h = o * jnp.tanh(c)
            return (h, c), (h, c)

        init = (jnp.zeros((N, H), x.dtype), jnp.zeros((N, H), x.dtype))
        (_, _), (h_seq, c_seq) = jax.lax.scan(step, init, seq)
        seq = h_seq
        h_last.append(h_seq[-1])
        c_last.append(c_seq[-1])
    return seq, (jnp.stack(h_last), jnp.stack(c_last))


def make_params(key, input_size, hidden_size, num_layers):
    """Deterministic init matching torch: U(-sqrt(1/H), sqrt(1/H))."""
    bound = 1.0 / jnp.sqrt(jnp.float32(hidden_size))
    params = []
    for layer in range(num_layers):
        in_sz = input_size if layer == 0 else hidden_size
        key, k1, k2, k3, k4 = jax.random.split(key, 5)
        params.append({
            'w_ih': jax.random.uniform(k1, (4 * hidden_size, in_sz),
                                       jnp.float32, -bound, bound),
            'w_hh': jax.random.uniform(k2, (4 * hidden_size, hidden_size),
                                       jnp.float32, -bound, bound),
            'b_ih': jax.random.uniform(k3, (4 * hidden_size,),
                                       jnp.float32, -bound, bound),
            'b_hh': jax.random.uniform(k4, (4 * hidden_size,),
                                       jnp.float32, -bound, bound),
        })
    return params


if __name__ == "__main__":
    # Small config: input_size=16, hidden_size=32, num_layers=2,
    # seq L=8, batch N=2, batch_first=False, unidirectional, dropout=0.
    L, N, I, H, NUM_LAYERS = 8, 2, 16, 32, 2

    key = jax.random.PRNGKey(0)
    kx, kp = jax.random.split(key)
    x = jax.random.normal(kx, (L, N, I), jnp.float32)
    params = make_params(kp, I, H, NUM_LAYERS)

    out, (h_n, c_n) = lstmx_forward(x, params)
    jax.block_until_ready((out, h_n, c_n))

    ref_out, (ref_hn, ref_cn) = lstmx_reference(x, params)
    assert out.shape == (L, N, H)
    assert h_n.shape == (NUM_LAYERS, N, H) and c_n.shape == (NUM_LAYERS, N, H)
    assert jnp.allclose(out, ref_out, atol=1e-5)
    assert jnp.allclose(h_n, ref_hn, atol=1e-5)
    assert jnp.allclose(c_n, ref_cn, atol=1e-5)

    # TODO(synk): bidirectional / dropout / proj_size paths of LSTMx are not
    # exercised here (module defaults: unidirectional, dropout=0, no proj).
    print("KERNEL_OK")
</pallas_src>

<mosaic_0001>
module attributes {stable_mosaic.version = 11 : i64} {
  func.func @_lstm_layer_kernel(%arg0: i32, %arg1: memref<8x8x16xf32, #tpu.memory_space<vmem>>, %arg2: memref<16x128xf32, #tpu.memory_space<vmem>>, %arg3: memref<32x128xf32, #tpu.memory_space<vmem>>, %arg4: memref<1x128xf32, #tpu.memory_space<vmem>>, %arg5: memref<8x8x32xf32, #tpu.memory_space<vmem>>, %arg6: memref<8x32xf32, #tpu.memory_space<vmem>>, %arg7: memref<8x8x128xf32, #tpu.memory_space<vmem>>, %arg8: memref<8x32xf32, #tpu.memory_space<vmem>>, %arg9: memref<8x32xf32, #tpu.memory_space<vmem>>) attributes {dimension_semantics = [#tpu.dimension_semantics<arbitrary>], iteration_bounds = array<i64: 1>, scalar_prefetch = 0 : i64, scratch_operands = 3 : i64, tpu.core_type = #tpu.core_type<tc>, window_params = [{transform_indices = @transform_0, window_bounds = array<i64: 8, 8, 16>}, {pipeline_mode = #tpu.pipeline_mode<synchronous>, transform_indices = @transform_1, window_bounds = array<i64: 16, 128>}, {pipeline_mode = #tpu.pipeline_mode<synchronous>, transform_indices = @transform_2, window_bounds = array<i64: 32, 128>}, {pipeline_mode = #tpu.pipeline_mode<synchronous>, transform_indices = @transform_3, window_bounds = array<i64: 1, 128>}, {transform_indices = @transform_4, window_bounds = array<i64: 8, 8, 32>}, {pipeline_mode = #tpu.pipeline_mode<synchronous>, transform_indices = @transform_5, window_bounds = array<i64: 8, 32>}]} {
    %c0_i32 = arith.constant 0 : i32
    %0 = arith.cmpi eq, %arg0, %c0_i32 : i32
    %1 = arith.extui %0 : i1 to i32
    %c0_i32_0 = arith.constant 0 : i32
    %2 = arith.cmpi ne, %1, %c0_i32_0 : i32
    scf.if %2 {
      %cst_87 = arith.constant 0.000000e+00 : f32
      %290 = vector.broadcast %cst_87 : f32 to vector<8x32xf32>
      %c0_88 = arith.constant 0 : index
      %c0_89 = arith.constant 0 : index
      %291 = vector.load %arg8[%c0_88, %c0_89] : memref<8x32xf32, #tpu.memory_space<vmem>>, vector<8x32xf32>
      tpu.vector_store %arg8[%c0_88, %c0_89], %290 {strides = array<i32>} : memref<8x32xf32, #tpu.memory_space<vmem>>, vector<8x32xf32>,
      %cst_90 = arith.constant 0.000000e+00 : f32
      %292 = vector.broadcast %cst_90 : f32 to vector<8x32xf32>
      %c0_91 = arith.constant 0 : index
      %c0_92 = arith.constant 0 : index
      %293 = vector.load %arg9[%c0_91, %c0_92] : memref<8x32xf32, #tpu.memory_space<vmem>>, vector<8x32xf32>
      tpu.vector_store %arg9[%c0_91, %c0_92], %292 {strides = array<i32>} : memref<8x32xf32, #tpu.memory_space<vmem>>, vector<8x32xf32>,
    } else {
    }
    %c0 = arith.constant 0 : index
    %c0_1 = arith.constant 0 : index
    %c0_2 = arith.constant 0 : index
    %3 = vector.load %arg1[%c0, %c0_1, %c0_2] : memref<8x8x16xf32, #tpu.memory_space<vmem>>, vector<8x8x16xf32>
    %4 = vector.shape_cast %3 : vector<8x8x16xf32> to vector<64x16xf32>
    %c0_3 = arith.constant 0 : index
    %c0_4 = arith.constant 0 : index
    %5 = vector.load %arg2[%c0_3, %c0_4] : memref<16x128xf32, #tpu.memory_space<vmem>>, vector<16x128xf32>
    %cst = arith.constant dense<0.000000e+00> : vector<64x128xf32>
    %6 = tpu.matmul %4, %5, %cst {dimension_numbers = #tpu.dot_dimension_numbers<[1], [0], [0], [1], [0, 0, 1, 1], [], []>} : vector<64x16xf32>, vector<16x128xf32>, vector<64x128xf32> -> vector<64x128xf32>
    %c0_5 = arith.constant 0 : index
    %c0_6 = arith.constant 0 : index
    %7 = vector.load %arg4[%c0_5, %c0_6] : memref<1x128xf32, #tpu.memory_space<vmem>>, vector<1x128xf32>
    %8 = vector.broadcast %7 : vector<1x128xf32> to vector<64x128xf32>
    %9 = arith.addf %6, %8 : vector<64x128xf32>
    %10 = vector.shape_cast %9 : vector<64x128xf32> to vector<8x8x128xf32>
    %c0_7 = arith.constant 0 : index
    %c0_8 = arith.constant 0 : index
    %c0_9 = arith.constant 0 : index
    %11 = vector.load %arg7[%c0_7, %c0_8, %c0_9] : memref<8x8x128xf32, #tpu.memory_space<vmem>>, vector<8x8x128xf32>
    tpu.vector_store %arg7[%c0_7, %c0_8, %c0_9], %10 {strides = array<i32>} : memref<8x8x128xf32, #tpu.memory_space<vmem>>, vector<8x8x128xf32>,
    %c0_10 = arith.constant 0 : index
    %c0_11 = arith.constant 0 : index
    %12 = vector.load %arg3[%c0_10, %c0_11] : memref<32x128xf32, #tpu.memory_space<vmem>>, vector<32x128xf32>
    %c0_12 = arith.constant 0 : index
    %c0_13 = arith.constant 0 : index
    %13 = vector.load %arg8[%c0_12, %c0_13] : memref<8x32xf32, #tpu.memory_space<vmem>>, vector<8x32xf32>
    %c0_14 = arith.constant 0 : index
    %c0_15 = arith.constant 0 : index
    %14 = vector.load %arg9[%c0_14, %c0_15] : memref<8x32xf32, #tpu.memory_space<vmem>>, vector<8x32xf32>
    %c0_i32_16 = arith.constant 0 : i32
    %15 = arith.index_cast %c0_i32_16 : i32 to index
    %c0_17 = arith.constant 0 : index
    %c0_18 = arith.constant 0 : index
    %16 = vector.load %arg7[%15, %c0_17, %c0_18] : memref<8x8x128xf32, #tpu.memory_space<vmem>>, vector<1x8x128xf32>
    %17 = vector.shape_cast %16 : vector<1x8x128xf32> to vector<8x128xf32>
    %cst_19 = arith.constant dense<0.000000e+00> : vector<8x128xf32>
    %18 = tpu.matmul %13, %12, %cst_19 {dimension_numbers = #tpu.dot_dimension_numbers<[1], [0], [0], [1], [0, 0, 1, 1], [], []>} : vector<8x32xf32>, vector<32x128xf32>, vector<8x128xf32> -> vector<8x128xf32>
    %19 = arith.addf %17, %18 : vector<8x128xf32>
    %20 = vector.extract_strided_slice %19 {offsets = [0, 0], sizes = [8, 32], strides = [1, 1]} : vector<8x128xf32> to vector<8x32xf32>
    %21 = arith.negf %20 : vector<8x32xf32>
    %22 = math.exp %21 : vector<8x32xf32>
    %cst_20 = arith.constant 1.000000e+00 : f32
    %23 = vector.broadcast %cst_20 : f32 to vector<8x32xf32>
    %24 = arith.addf %23, %22 : vector<8x32xf32>
    %25 = arith.divf %23, %24 : vector<8x32xf32>
    %26 = vector.extract_strided_slice %19 {offsets = [0, 32], sizes = [8, 32], strides = [1, 1]} : vector<8x128xf32> to vector<8x32xf32>
    %27 = arith.negf %26 : vector<8x32xf32>
    %28 = math.exp %27 : vector<8x32xf32>
    %cst_21 = arith.constant 1.000000e+00 : f32
    %29 = vector.broadcast %cst_21 : f32 to vector<8x32xf32>
    %30 = arith.addf %29, %28 : vector<8x32xf32>
    %31 = arith.divf %29, %30 : vector<8x32xf32>
    %32 = vector.extract_strided_slice %19 {offsets = [0, 64], sizes = [8, 32], strides = [1, 1]} : vector<8x128xf32> to vector<8x32xf32>
    %33 = math.tanh %32 : vector<8x32xf32>
    %34 = vector.extract_strided_slice %19 {offsets = [0, 96], sizes = [8, 32], strides = [1, 1]} : vector<8x128xf32> to vector<8x32xf32>
    %35 = arith.negf %34 : vector<8x32xf32>
    %36 = math.exp %35 : vector<8x32xf32>
    %cst_22 = arith.constant 1.000000e+00 : f32
    %37 = vector.broadcast %cst_22 : f32 to vector<8x32xf32>
    %38 = arith.addf %37, %36 : vector<8x32xf32>
    %39 = arith.divf %37, %38 : vector<8x32xf32>
    %40 = arith.mulf %31, %14 : vector<8x32xf32>
    %41 = arith.mulf %25, %33 : vector<8x32xf32>
    %42 = arith.addf %40, %41 : vector<8x32xf32>
    %43 = math.tanh %42 : vector<8x32xf32>
    %44 = arith.mulf %39, %43 : vector<8x32xf32>
    %45 = arith.index_cast %c0_i32_16 : i32 to index
    %c0_23 = arith.constant 0 : index
    %c0_24 = arith.constant 0 : index
    %46 = vector.load %arg5[%45, %c0_23, %c0_24] : memref<8x8x32xf32, #tpu.memory_space<vmem>>, vector<1x8x32xf32>
    %47 = vector.shape_cast %46 : vector<1x8x32xf32> to vector<8x32xf32>
    %48 = vector.shape_cast %44 : vector<8x32xf32> to vector<1x8x32xf32>
    tpu.vector_store %arg5[%45, %c0_23, %c0_24], %48 {strides = array<i32>} : memref<8x8x32xf32, #tpu.memory_space<vmem>>, vector<1x8x32xf32>,
    %c1_i32 = arith.constant 1 : i32
    %49 = arith.index_cast %c1_i32 : i32 to index
    %c0_25 = arith.constant 0 : index
    %c0_26 = arith.constant 0 : index
    %50 = vector.load %arg7[%49, %c0_25, %c0_26] : memref<8x8x128xf32, #tpu.memory_space<vmem>>, vector<1x8x128xf32>
    %51 = vector.shape_cast %50 : vector<1x8x128xf32> to vector<8x128xf32>
    %cst_27 = arith.constant dense<0.000000e+00> : vector<8x128xf32>
    %52 = tpu.matmul %44, %12, %cst_27 {dimension_numbers = #tpu.dot_dimension_numbers<[1], [0], [0], [1], [0, 0, 1, 1], [], []>} : vector<8x32xf32>, vector<32x128xf32>, vector<8x128xf32> -> vector<8x128xf32>
    %53 = arith.addf %51, %52 : vector<8x128xf32>
    %54 = vector.extract_strided_slice %53 {offsets = [0, 0], sizes = [8, 32], strides = [1, 1]} : vector<8x128xf32> to vector<8x32xf32>
    %55 = arith.negf %54 : vector<8x32xf32>
    %56 = math.exp %55 : vector<8x32xf32>
    %cst_28 = arith.constant 1.000000e+00 : f32
    %57 = vector.broadcast %cst_28 : f32 to vector<8x32xf32>
    %58 = arith.addf %57, %56 : vector<8x32xf32>
    %59 = arith.divf %57, %58 : vector<8x32xf32>
    %60 = vector.extract_strided_slice %53 {offsets = [0, 32], sizes = [8, 32], strides = [1, 1]} : vector<8x128xf32> to vector<8x32xf32>
    %61 = arith.negf %60 : vector<8x32xf32>
    %62 = math.exp %61 : vector<8x32xf32>
    %cst_29 = arith.constant 1.000000e+00 : f32
    %63 = vector.broadcast %cst_29 : f32 to vector<8x32xf32>
    %64 = arith.addf %63, %62 : vector<8x32xf32>
    %65 = arith.divf %63, %64 : vector<8x32xf32>
    %66 = vector.extract_strided_slice %53 {offsets = [0, 64], sizes = [8, 32], strides = [1, 1]} : vector<8x128xf32> to vector<8x32xf32>
    %67 = math.tanh %66 : vector<8x32xf32>
    %68 = vector.extract_strided_slice %53 {offsets = [0, 96], sizes = [8, 32], strides = [1, 1]} : vector<8x128xf32> to vector<8x32xf32>
    %69 = arith.negf %68 : vector<8x32xf32>
    %70 = math.exp %69 : vector<8x32xf32>
    %cst_30 = arith.constant 1.000000e+00 : f32
    %71 = vector.broadcast %cst_30 : f32 to vector<8x32xf32>
    %72 = arith.addf %71, %70 : vector<8x32xf32>
    %73 = arith.divf %71, %72 : vector<8x32xf32>
    %74 = arith.mulf %65, %42 : vector<8x32xf32>
    %75 = arith.mulf %59, %67 : vector<8x32xf32>
    %76 = arith.addf %74, %75 : vector<8x32xf32>
    %77 = math.tanh %76 : vector<8x32xf32>
    %78 = arith.mulf %73, %77 : vector<8x32xf32>
    %79 = arith.index_cast %c1_i32 : i32 to index
    %c0_31 = arith.constant 0 : index
    %c0_32 = arith.constant 0 : index
    %80 = vector.load %arg5[%79, %c0_31, %c0_32] : memref<8x8x32xf32, #tpu.memory_space<vmem>>, vector<1x8x32xf32>
    %81 = vector.shape_cast %80 : vector<1x8x32xf32> to vector<8x32xf32>
    %82 = vector.shape_cast %78 : vector<8x32xf32> to vector<1x8x32xf32>
    tpu.vector_store %arg5[%79, %c0_31, %c0_32], %82 {strides = array<i32>} : memref<8x8x32xf32, #tpu.memory_space<vmem>>, vector<1x8x32xf32>,
    %c2_i32 = arith.constant 2 : i32
    %83 = arith.index_cast %c2_i32 : i32 to index
    %c0_33 = arith.constant 0 : index
    %c0_34 = arith.constant 0 : index
    %84 = vector.load %arg7[%83, %c0_33, %c0_34] : memref<8x8x128xf32, #tpu.memory_space<vmem>>, vector<1x8x128xf32>
    %85 = vector.shape_cast %84 : vector<1x8x128xf32> to vector<8x128xf32>
    %cst_35 = arith.constant dense<0.000000e+00> : vector<8x128xf32>
    %86 = tpu.matmul %78, %12, %cst_35 {dimension_numbers = #tpu.dot_dimension_numbers<[1], [0], [0], [1], [0, 0, 1, 1], [], []>} : vector<8x32xf32>, vector<32x128xf32>, vector<8x128xf32> -> vector<8x128xf32>
    %87 = arith.addf %85, %86 : vector<8x128xf32>
    %88 = vector.extract_strided_slice %87 {offsets = [0, 0], sizes = [8, 32], strides = [1, 1]} : vector<8x128xf32> to vector<8x32xf32>
    %89 = arith.negf %88 : vector<8x32xf32>
    %90 = math.exp %89 : vector<8x32xf32>
    %cst_36 = arith.constant 1.000000e+00 : f32
    %91 = vector.broadcast %cst_36 : f32 to vector<8x32xf32>
    %92 = arith.addf %91, %90 : vector<8x32xf32>
    %93 = arith.divf %91, %92 : vector<8x32xf32>
    %94 = vector.extract_strided_slice %87 {offsets = [0, 32], sizes = [8, 32], strides = [1, 1]} : vector<8x128xf32> to vector<8x32xf32>
    %95 = arith.negf %94 : vector<8x32xf32>
    %96 = math.exp %95 : vector<8x32xf32>
    %cst_37 = arith.constant 1.000000e+00 : f32
    %97 = vector.broadcast %cst_37 : f32 to vector<8x32xf32>
    %98 = arith.addf %97, %96 : vector<8x32xf32>
    %99 = arith.divf %97, %98 : vector<8x32xf32>
    %100 = vector.extract_strided_slice %87 {offsets = [0, 64], sizes = [8, 32], strides = [1, 1]} : vector<8x128xf32> to vector<8x32xf32>
    %101 = math.tanh %100 : vector<8x32xf32>
    %102 = vector.extract_strided_slice %87 {offsets = [0, 96], sizes = [8, 32], strides = [1, 1]} : vector<8x128xf32> to vector<8x32xf32>
    %103 = arith.negf %102 : vector<8x32xf32>
    %104 = math.exp %103 : vector<8x32xf32>
    %cst_38 = arith.constant 1.000000e+00 : f32
    %105 = vector.broadcast %cst_38 : f32 to vector<8x32xf32>
    %106 = arith.addf %105, %104 : vector<8x32xf32>
    %107 = arith.divf %105, %106 : vector<8x32xf32>
    %108 = arith.mulf %99, %76 : vector<8x32xf32>
    %109 = arith.mulf %93, %101 : vector<8x32xf32>
    %110 = arith.addf %108, %109 : vector<8x32xf32>
    %111 = math.tanh %110 : vector<8x32xf32>
    %112 = arith.mulf %107, %111 : vector<8x32xf32>
    %113 = arith.index_cast %c2_i32 : i32 to index
    %c0_39 = arith.constant 0 : index
    %c0_40 = arith.constant 0 : index
    %114 = vector.load %arg5[%113, %c0_39, %c0_40] : memref<8x8x32xf32, #tpu.memory_space<vmem>>, vector<1x8x32xf32>
    %115 = vector.shape_cast %114 : vector<1x8x32xf32> to vector<8x32xf32>
    %116 = vector.shape_cast %112 : vector<8x32xf32> to vector<1x8x32xf32>
    tpu.vector_store %arg5[%113, %c0_39, %c0_40], %116 {strides = array<i32>} : memref<8x8x32xf32, #tpu.memory_space<vmem>>, vector<1x8x32xf32>,
    %c3_i32 = arith.constant 3 : i32
    %117 = arith.index_cast %c3_i32 : i32 to index
    %c0_41 = arith.constant 0 : index
    %c0_42 = arith.constant 0 : index
    %118 = vector.load %arg7[%117, %c0_41, %c0_42] : memref<8x8x128xf32, #tpu.memory_space<vmem>>, vector<1x8x128xf32>
    %119 = vector.shape_cast %118 : vector<1x8x128xf32> to vector<8x128xf32>
    %cst_43 = arith.constant dense<0.000000e+00> : vector<8x128xf32>
    %120 = tpu.matmul %112, %12, %cst_43 {dimension_numbers = #tpu.dot_dimension_numbers<[1], [0], [0], [1], [0, 0, 1, 1], [], []>} : vector<8x32xf32>, vector<32x128xf32>, vector<8x128xf32> -> vector<8x128xf32>
    %121 = arith.addf %119, %120 : vector<8x128xf32>
    %122 = vector.extract_strided_slice %121 {offsets = [0, 0], sizes = [8, 32], strides = [1, 1]} : vector<8x128xf32> to vector<8x32xf32>
    %123 = arith.negf %122 : vector<8x32xf32>
    %124 = math.exp %123 : vector<8x32xf32>
    %cst_44 = arith.constant 1.000000e+00 : f32
    %125 = vector.broadcast %cst_44 : f32 to vector<8x32xf32>
    %126 = arith.addf %125, %124 : vector<8x32xf32>
    %127 = arith.divf %125, %126 : vector<8x32xf32>
    %128 = vector.extract_strided_slice %121 {offsets = [0, 32], sizes = [8, 32], strides = [1, 1]} : vector<8x128xf32> to vector<8x32xf32>
    %129 = arith.negf %128 : vector<8x32xf32>
    %130 = math.exp %129 : vector<8x32xf32>
    %cst_45 = arith.constant 1.000000e+00 : f32
    %131 = vector.broadcast %cst_45 : f32 to vector<8x32xf32>
    %132 = arith.addf %131, %130 : vector<8x32xf32>
    %133 = arith.divf %131, %132 : vector<8x32xf32>
    %134 = vector.extract_strided_slice %121 {offsets = [0, 64], sizes = [8, 32], strides = [1, 1]} : vector<8x128xf32> to vector<8x32xf32>
    %135 = math.tanh %134 : vector<8x32xf32>
    %136 = vector.extract_strided_slice %121 {offsets = [0, 96], sizes = [8, 32], strides = [1, 1]} : vector<8x128xf32> to vector<8x32xf32>
    %137 = arith.negf %136 : vector<8x32xf32>
    %138 = math.exp %137 : vector<8x32xf32>
    %cst_46 = arith.constant 1.000000e+00 : f32
    %139 = vector.broadcast %cst_46 : f32 to vector<8x32xf32>
    %140 = arith.addf %139, %138 : vector<8x32xf32>
    %141 = arith.divf %139, %140 : vector<8x32xf32>
    %142 = arith.mulf %133, %110 : vector<8x32xf32>
    %143 = arith.mulf %127, %135 : vector<8x32xf32>
    %144 = arith.addf %142, %143 : vector<8x32xf32>
    %145 = math.tanh %144 : vector<8x32xf32>
    %146 = arith.mulf %141, %145 : vector<8x32xf32>
    %147 = arith.index_cast %c3_i32 : i32 to index
    %c0_47 = arith.constant 0 : index
    %c0_48 = arith.constant 0 : index
    %148 = vector.load %arg5[%147, %c0_47, %c0_48] : memref<8x8x32xf32, #tpu.memory_space<vmem>>, vector<1x8x32xf32>
    %149 = vector.shape_cast %148 : vector<1x8x32xf32> to vector<8x32xf32>
    %150 = vector.shape_cast %146 : vector<8x32xf32> to vector<1x8x32xf32>
    tpu.vector_store %arg5[%147, %c0_47, %c0_48], %150 {strides = array<i32>} : memref<8x8x32xf32, #tpu.memory_space<vmem>>, vector<1x8x32xf32>,
    %c4_i32 = arith.constant 4 : i32
    %151 = arith.index_cast %c4_i32 : i32 to index
    %c0_49 = arith.constant 0 : index
    %c0_50 = arith.constant 0 : index
    %152 = vector.load %arg7[%151, %c0_49, %c0_50] : memref<8x8x128xf32, #tpu.memory_space<vmem>>, vector<1x8x128xf32>
    %153 = vector.shape_cast %152 : vector<1x8x128xf32> to vector<8x128xf32>
    %cst_51 = arith.constant dense<0.000000e+00> : vector<8x128xf32>
    %154 = tpu.matmul %146, %12, %cst_51 {dimension_numbers = #tpu.dot_dimension_numbers<[1], [0], [0], [1], [0, 0, 1, 1], [], []>} : vector<8x32xf32>, vector<32x128xf32>, vector<8x128xf32> -> vector<8x128xf32>
    %155 = arith.addf %153, %154 : vector<8x128xf32>
    %156 = vector.extract_strided_slice %155 {offsets = [0, 0], sizes = [8, 32], strides = [1, 1]} : vector<8x128xf32> to vector<8x32xf32>
    %157 = arith.negf %156 : vector<8x32xf32>
    %158 = math.exp %157 : vector<8x32xf32>
    %cst_52 = arith.constant 1.000000e+00 : f32
    %159 = vector.broadcast %cst_52 : f32 to vector<8x32xf32>
    %160 = arith.addf %159, %158 : vector<8x32xf32>
    %161 = arith.divf %159, %160 : vector<8x32xf32>
    %162 = vector.extract_strided_slice %155 {offsets = [0, 32], sizes = [8, 32], strides = [1, 1]} : vector<8x128xf32> to vector<8x32xf32>
    %163 = arith.negf %162 : vector<8x32xf32>
    %164 = math.exp %163 : vector<8x32xf32>
    %cst_53 = arith.constant 1.000000e+00 : f32
    %165 = vector.broadcast %cst_53 : f32 to vector<8x32xf32>
    %166 = arith.addf %165, %164 : vector<8x32xf32>
    %167 = arith.divf %165, %166 : vector<8x32xf32>
    %168 = vector.extract_strided_slice %155 {offsets = [0, 64], sizes = [8, 32], strides = [1, 1]} : vector<8x128xf32> to vector<8x32xf32>
    %169 = math.tanh %168 : vector<8x32xf32>
    %170 = vector.extract_strided_slice %155 {offsets = [0, 96], sizes = [8, 32], strides = [1, 1]} : vector<8x128xf32> to vector<8x32xf32>
    %171 = arith.negf %170 : vector<8x32xf32>
    %172 = math.exp %171 : vector<8x32xf32>
    %cst_54 = arith.constant 1.000000e+00 : f32
    %173 = vector.broadcast %cst_54 : f32 to vector<8x32xf32>
    %174 = arith.addf %173, %172 : vector<8x32xf32>
    %175 = arith.divf %173, %174 : vector<8x32xf32>
    %176 = arith.mulf %167, %144 : vector<8x32xf32>
    %177 = arith.mulf %161, %169 : vector<8x32xf32>
    %178 = arith.addf %176, %177 : vector<8x32xf32>
    %179 = math.tanh %178 : vector<8x32xf32>
    %180 = arith.mulf %175, %179 : vector<8x32xf32>
    %181 = arith.index_cast %c4_i32 : i32 to index
    %c0_55 = arith.constant 0 : index
    %c0_56 = arith.constant 0 : index
    %182 = vector.load %arg5[%181, %c0_55, %c0_56] : memref<8x8x32xf32, #tpu.memory_space<vmem>>, vector<1x8x32xf32>
    %183 = vector.shape_cast %182 : vector<1x8x32xf32> to vector<8x32xf32>
    %184 = vector.shape_cast %180 : vector<8x32xf32> to vector<1x8x32xf32>
    tpu.vector_store %arg5[%181, %c0_55, %c0_56], %184 {strides = array<i32>} : memref<8x8x32xf32, #tpu.memory_space<vmem>>, vector<1x8x32xf32>,
    %c5_i32 = arith.constant 5 : i32
    %185 = arith.index_cast %c5_i32 : i32 to index
    %c0_57 = arith.constant 0 : index
    %c0_58 = arith.constant 0 : index
    %186 = vector.load %arg7[%185, %c0_57, %c0_58] : memref<8x8x128xf32, #tpu.memory_space<vmem>>, vector<1x8x128xf32>
    %187 = vector.shape_cast %186 : vector<1x8x128xf32> to vector<8x128xf32>
    %cst_59 = arith.constant dense<0.000000e+00> : vector<8x128xf32>
    %188 = tpu.matmul %180, %12, %cst_59 {dimension_numbers = #tpu.dot_dimension_numbers<[1], [0], [0], [1], [0, 0, 1, 1], [], []>} : vector<8x32xf32>, vector<32x128xf32>, vector<8x128xf32> -> vector<8x128xf32>
    %189 = arith.addf %187, %188 : vector<8x128xf32>
    %190 = vector.extract_strided_slice %189 {offsets = [0, 0], sizes = [8, 32], strides = [1, 1]} : vector<8x128xf32> to vector<8x32xf32>
    %191 = arith.negf %190 : vector<8x32xf32>
    %192 = math.exp %191 : vector<8x32xf32>
    %cst_60 = arith.constant 1.000000e+00 : f32
    %193 = vector.broadcast %cst_60 : f32 to vector<8x32xf32>
    %194 = arith.addf %193, %192 : vector<8x32xf32>
    %195 = arith.divf %193, %194 : vector<8x32xf32>
    %196 = vector.extract_strided_slice %189 {offsets = [0, 32], sizes = [8, 32], strides = [1, 1]} : vector<8x128xf32> to vector<8x32xf32>
    %197 = arith.negf %196 : vector<8x32xf32>
    %198 = math.exp %197 : vector<8x32xf32>
    %cst_61 = arith.constant 1.000000e+00 : f32
    %199 = vector.broadcast %cst_61 : f32 to vector<8x32xf32>
    %200 = arith.addf %199, %198 : vector<8x32xf32>
    %201 = arith.divf %199, %200 : vector<8x32xf32>
    %202 = vector.extract_strided_slice %189 {offsets = [0, 64], sizes = [8, 32], strides = [1, 1]} : vector<8x128xf32> to vector<8x32xf32>
    %203 = math.tanh %202 : vector<8x32xf32>
    %204 = vector.extract_strided_slice %189 {offsets = [0, 96], sizes = [8, 32], strides = [1, 1]} : vector<8x128xf32> to vector<8x32xf32>
    %205 = arith.negf %204 : vector<8x32xf32>
    %206 = math.exp %205 : vector<8x32xf32>
    %cst_62 = arith.constant 1.000000e+00 : f32
    %207 = vector.broadcast %cst_62 : f32 to vector<8x32xf32>
    %208 = arith.addf %207, %206 : vector<8x32xf32>
    %209 = arith.divf %207, %208 : vector<8x32xf32>
    %210 = arith.mulf %201, %178 : vector<8x32xf32>
    %211 = arith.mulf %195, %203 : vector<8x32xf32>
    %212 = arith.addf %210, %211 : vector<8x32xf32>
    %213 = math.tanh %212 : vector<8x32xf32>
    %214 = arith.mulf %209, %213 : vector<8x32xf32>
    %215 = arith.index_cast %c5_i32 : i32 to index
    %c0_63 = arith.constant 0 : index
    %c0_64 = arith.constant 0 : index
    %216 = vector.load %arg5[%215, %c0_63, %c0_64] : memref<8x8x32xf32, #tpu.memory_space<vmem>>, vector<1x8x32xf32>
    %217 = vector.shape_cast %216 : vector<1x8x32xf32> to vector<8x32xf32>
    %218 = vector.shape_cast %214 : vector<8x32xf32> to vector<1x8x32xf32>
    tpu.vector_store %arg5[%215, %c0_63, %c0_64], %218 {strides = array<i32>} : memref<8x8x32xf32, #tpu.memory_space<vmem>>, vector<1x8x32xf32>,
    %c6_i32 = arith.constant 6 : i32
    %219 = arith.index_cast %c6_i32 : i32 to index
    %c0_65 = arith.constant 0 : index
    %c0_66 = arith.constant 0 : index
    %220 = vector.load %arg7[%219, %c0_65, %c0_66] : memref<8x8x128xf32, #tpu.memory_space<vmem>>, vector<1x8x128xf32>
    %221 = vector.shape_cast %220 : vector<1x8x128xf32> to vector<8x128xf32>
    %cst_67 = arith.constant dense<0.000000e+00> : vector<8x128xf32>
    %222 = tpu.matmul %214, %12, %cst_67 {dimension_numbers = #tpu.dot_dimension_numbers<[1], [0], [0], [1], [0, 0, 1, 1], [], []>} : vector<8x32xf32>, vector<32x128xf32>, vector<8x128xf32> -> vector<8x128xf32>
    %223 = arith.addf %221, %222 : vector<8x128xf32>
    %224 = vector.extract_strided_slice %223 {offsets = [0, 0], sizes = [8, 32], strides = [1, 1]} : vector<8x128xf32> to vector<8x32xf32>
    %225 = arith.negf %224 : vector<8x32xf32>
    %226 = math.exp %225 : vector<8x32xf32>
    %cst_68 = arith.constant 1.000000e+00 : f32
    %227 = vector.broadcast %cst_68 : f32 to vector<8x32xf32>
    %228 = arith.addf %227, %226 : vector<8x32xf32>
    %229 = arith.divf %227, %228 : vector<8x32xf32>
    %230 = vector.extract_strided_slice %223 {offsets = [0, 32], sizes = [8, 32], strides = [1, 1]} : vector<8x128xf32> to vector<8x32xf32>
    %231 = arith.negf %230 : vector<8x32xf32>
    %232 = math.exp %231 : vector<8x32xf32>
    %cst_69 = arith.constant 1.000000e+00 : f32
    %233 = vector.broadcast %cst_69 : f32 to vector<8x32xf32>
    %234 = arith.addf %233, %232 : vector<8x32xf32>
    %235 = arith.divf %233, %234 : vector<8x32xf32>
    %236 = vector.extract_strided_slice %223 {offsets = [0, 64], sizes = [8, 32], strides = [1, 1]} : vector<8x128xf32> to vector<8x32xf32>
    %237 = math.tanh %236 : vector<8x32xf32>
    %238 = vector.extract_strided_slice %223 {offsets = [0, 96], sizes = [8, 32], strides = [1, 1]} : vector<8x128xf32> to vector<8x32xf32>
    %239 = arith.negf %238 : vector<8x32xf32>
    %240 = math.exp %239 : vector<8x32xf32>
    %cst_70 = arith.constant 1.000000e+00 : f32
    %241 = vector.broadcast %cst_70 : f32 to vector<8x32xf32>
    %242 = arith.addf %241, %240 : vector<8x32xf32>
    %243 = arith.divf %241, %242 : vector<8x32xf32>
    %244 = arith.mulf %235, %212 : vector<8x32xf32>
    %245 = arith.mulf %229, %237 : vector<8x32xf32>
    %246 = arith.addf %244, %245 : vector<8x32xf32>
    %247 = math.tanh %246 : vector<8x32xf32>
    %248 = arith.mulf %243, %247 : vector<8x32xf32>
    %249 = arith.index_cast %c6_i32 : i32 to index
    %c0_71 = arith.constant 0 : index
    %c0_72 = arith.constant 0 : index
    %250 = vector.load %arg5[%249, %c0_71, %c0_72] : memref<8x8x32xf32, #tpu.memory_space<vmem>>, vector<1x8x32xf32>
    %251 = vector.shape_cast %250 : vector<1x8x32xf32> to vector<8x32xf32>
    %252 = vector.shape_cast %248 : vector<8x32xf32> to vector<1x8x32xf32>
    tpu.vector_store %arg5[%249, %c0_71, %c0_72], %252 {strides = array<i32>} : memref<8x8x32xf32, #tpu.memory_space<vmem>>, vector<1x8x32xf32>,
    %c7_i32 = arith.constant 7 : i32
    %253 = arith.index_cast %c7_i32 : i32 to index
    %c0_73 = arith.constant 0 : index
    %c0_74 = arith.constant 0 : index
    %254 = vector.load %arg7[%253, %c0_73, %c0_74] : memref<8x8x128xf32, #tpu.memory_space<vmem>>, vector<1x8x128xf32>
    %255 = vector.shape_cast %254 : vector<1x8x128xf32> to vector<8x128xf32>
    %cst_75 = arith.constant dense<0.000000e+00> : vector<8x128xf32>
    %256 = tpu.matmul %248, %12, %cst_75 {dimension_numbers = #tpu.dot_dimension_numbers<[1], [0], [0], [1], [0, 0, 1, 1], [], []>} : vector<8x32xf32>, vector<32x128xf32>, vector<8x128xf32> -> vector<8x128xf32>
    %257 = arith.addf %255, %256 : vector<8x128xf32>
    %258 = vector.extract_strided_slice %257 {offsets = [0, 0], sizes = [8, 32], strides = [1, 1]} : vector<8x128xf32> to vector<8x32xf32>
    %259 = arith.negf %258 : vector<8x32xf32>
    %260 = math.exp %259 : vector<8x32xf32>
    %cst_76 = arith.constant 1.000000e+00 : f32
    %261 = vector.broadcast %cst_76 : f32 to vector<8x32xf32>
    %262 = arith.addf %261, %260 : vector<8x32xf32>
    %263 = arith.divf %261, %262 : vector<8x32xf32>
    %264 = vector.extract_strided_slice %257 {offsets = [0, 32], sizes = [8, 32], strides = [1, 1]} : vector<8x128xf32> to vector<8x32xf32>
    %265 = arith.negf %264 : vector<8x32xf32>
    %266 = math.exp %265 : vector<8x32xf32>
    %cst_77 = arith.constant 1.000000e+00 : f32
    %267 = vector.broadcast %cst_77 : f32 to vector<8x32xf32>
    %268 = arith.addf %267, %266 : vector<8x32xf32>
    %269 = arith.divf %267, %268 : vector<8x32xf32>
    %270 = vector.extract_strided_slice %257 {offsets = [0, 64], sizes = [8, 32], strides = [1, 1]} : vector<8x128xf32> to vector<8x32xf32>
    %271 = math.tanh %270 : vector<8x32xf32>
    %272 = vector.extract_strided_slice %257 {offsets = [0, 96], sizes = [8, 32], strides = [1, 1]} : vector<8x128xf32> to vector<8x32xf32>
    %273 = arith.negf %272 : vector<8x32xf32>
    %274 = math.exp %273 : vector<8x32xf32>
    %cst_78 = arith.constant 1.000000e+00 : f32
    %275 = vector.broadcast %cst_78 : f32 to vector<8x32xf32>
    %276 = arith.addf %275, %274 : vector<8x32xf32>
    %277 = arith.divf %275, %276 : vector<8x32xf32>
    %278 = arith.mulf %269, %246 : vector<8x32xf32>
    %279 = arith.mulf %263, %271 : vector<8x32xf32>
    %280 = arith.addf %278, %279 : vector<8x32xf32>
    %281 = math.tanh %280 : vector<8x32xf32>
    %282 = arith.mulf %277, %281 : vector<8x32xf32>
    %283 = arith.index_cast %c7_i32 : i32 to index
    %c0_79 = arith.constant 0 : index
    %c0_80 = arith.constant 0 : index
    %284 = vector.load %arg5[%283, %c0_79, %c0_80] : memref<8x8x32xf32, #tpu.memory_space<vmem>>, vector<1x8x32xf32>
    %285 = vector.shape_cast %284 : vector<1x8x32xf32> to vector<8x32xf32>
    %286 = vector.shape_cast %282 : vector<8x32xf32> to vector<1x8x32xf32>
    tpu.vector_store %arg5[%283, %c0_79, %c0_80], %286 {strides = array<i32>} : memref<8x8x32xf32, #tpu.memory_space<vmem>>, vector<1x8x32xf32>,
    %c8_i32 = arith.constant 8 : i32
    %c0_81 = arith.constant 0 : index
    %c0_82 = arith.constant 0 : index
    %287 = vector.load %arg8[%c0_81, %c0_82] : memref<8x32xf32, #tpu.memory_space<vmem>>, vector<8x32xf32>
    tpu.vector_store %arg8[%c0_81, %c0_82], %282 {strides = array<i32>} : memref<8x32xf32, #tpu.memory_space<vmem>>, vector<8x32xf32>,
    %c0_83 = arith.constant 0 : index
    %c0_84 = arith.constant 0 : index
    %288 = vector.load %arg9[%c0_83, %c0_84] : memref<8x32xf32, #tpu.memory_space<vmem>>, vector<8x32xf32>
    tpu.vector_store %arg9[%c0_83, %c0_84], %280 {strides = array<i32>} : memref<8x32xf32, #tpu.memory_space<vmem>>, vector<8x32xf32>,
    %c0_85 = arith.constant 0 : index
    %c0_86 = arith.constant 0 : index
    %289 = vector.load %arg6[%c0_85, %c0_86] : memref<8x32xf32, #tpu.memory_space<vmem>>, vector<8x32xf32>
    tpu.vector_store %arg6[%c0_85, %c0_86], %280 {strides = array<i32>} : memref<8x32xf32, #tpu.memory_space<vmem>>, vector<8x32xf32>,
    return
  }
  func.func @transform_0(%arg0: i32) -> (i32, i32, i32) {
    %c0_i32 = arith.constant 0 : i32
    %c0_i32_0 = arith.constant 0 : i32
    %c0_i32_1 = arith.constant 0 : i32
    return %arg0, %c0_i32, %c0_i32_0 : i32, i32, i32
  }
  func.func @transform_1(%arg0: i32) -> (i32, i32) {
    %c0_i32 = arith.constant 0 : i32
    %c0_i32_0 = arith.constant 0 : i32
    %c0_i32_1 = arith.constant 0 : i32
    return %c0_i32, %c0_i32_0 : i32, i32
  }
  func.func @transform_2(%arg0: i32) -> (i32, i32) {
    %c0_i32 = arith.constant 0 : i32
    %c0_i32_0 = arith.constant 0 : i32
    %c0_i32_1 = arith.constant 0 : i32
    return %c0_i32, %c0_i32_0 : i32, i32
  }
  func.func @transform_3(%arg0: i32) -> (i32, i32) {
    %c0_i32 = arith.constant 0 : i32
    %c0_i32_0 = arith.constant 0 : i32
    %c0_i32_1 = arith.constant 0 : i32
    return %c0_i32, %c0_i32_0 : i32, i32
  }
  func.func @transform_4(%arg0: i32) -> (i32, i32, i32) {
    %c0_i32 = arith.constant 0 : i32
    %c0_i32_0 = arith.constant 0 : i32
    %c0_i32_1 = arith.constant 0 : i32
    return %arg0, %c0_i32, %c0_i32_0 : i32, i32, i32
  }
  func.func @transform_5(%arg0: i32) -> (i32, i32) {
    %c0_i32 = arith.constant 0 : i32
    %c0_i32_0 = arith.constant 0 : i32
    %c0_i32_1 = arith.constant 0 : i32
    return %c0_i32, %c0_i32_0 : i32, i32
  }
}

</mosaic_0001>

<bundles_post_ra>
// kernel: tpu_custom_call.1
= control target key start
LH: loop header
LB: loop body
LE: loop exit
PB: predicated region body
PF: predicated region fallthrough
CT: control target
= control target key end

     0   :  { %11 = vsyncpa [#allocation6], 0  ;;  %s1802_s0 = inlined_call_operand.hbm [shape: f32[8,8,16], index: 0, kind: input, shape index: {}]   ;;  %s1803_s1 = inlined_call_operand.hbm [shape: f32[16,128], index: 1, kind: input, shape index: {}]   ;;  %s1804_s2 = inlined_call_operand.hbm [shape: f32[32,128], index: 2, kind: input, shape index: {}]   ;;  %s1805_s3 = inlined_call_operand.vmem [shape: f32[1,128], index: 3, kind: input, shape index: {}]   ;;  %s1806_s4 = inlined_call_operand.hbm [shape: f32[8,8,32], index: 4, kind: output, shape index: {0}]   ;;  %s1807_s5 = inlined_call_operand.hbm [shape: f32[8,32], index: 5, kind: output, shape index: {1}]  }
   0x1   :  { %12 = vsyncpa [#allocation9], 0 }
   0x2   :  { %13 = vsyncpa [#allocation7], 0 }
   0x3   :  { %14 = vsyncpa [#allocation13], 0  ;;  %s1539_s18 = smov [#allocation8]   ;;  %s1540_s20 = smov [#allocation5]  }
   0x4   :  { %s32_s19 = sshll.u32 %s1539_s18, 4  ;;  %s20_s21 = sshll.u32 %s1540_s20, 4  ;;  %s33_s19 = int_to_ptr.vmem [resolvable:$true] %s32_s19  ;;  %s1582_s21 = int_to_ptr.vmem [resolvable:$true] %s20_s21 }
   0x5   :  { %s1421_s24 = scalar_lea.hbm %s1803_s1, 256 }
   0x6   :  { %p1422_p0 = scmp.ne.s32.totalorder %s1803_s1, %s1421_s24  ;;  %p1425_p1 = scmp.lt.u32.totalorder %s1421_s24, %s1803_s1 }
   0x8   :  { %p1427_p2 = pnand %p1425_p1, %p1422_p0 }
   0xa   :  { %1430 = shalt.err (!%p1427_p2)
}
   0xb   :  { %s1431_s29 = scalar_lea.vmem %s33_s19, 256  ;;  %p1436_p4 = scmp.lt.s32.totalorder %s33_s19, %s33_s19 }
   0xc   :  { %p1432_p3 = scmp.ne.s32.totalorder %s33_s19, %s1431_s29  ;;  %p1437_p5 = scmp.lt.s32.totalorder %s1431_s29, %s1431_s29 }
   0xe   :  { %p1438_p6 = por %p1437_p5, %p1436_p4 }
  0x10   :  { %p1439_p7 = pnand %p1438_p6, %p1432_p3 }
  0x12   :  { %1442 = shalt.err (!%p1439_p7)
}
  0x13   :  { %s1541_s30 = smov 128   ;;  %s1542_s6 = smov 8  }
  0x14   :  { %38 = dma.hbm_to_vmem [thread:$0]  %s1803_s1, 256, %s33_s19, [#allocation9], %s1541_s30, %s1541_s30, %s1542_s6  }
  0x15   :  { %s1443_s11 = scalar_lea.hbm %s1802_s0, 1024 }
  0x16   :  { %p1444_p8 = scmp.ne.s32.totalorder %s1802_s0, %s1443_s11  ;;  %p1447_p9 = scmp.lt.u32.totalorder %s1443_s11, %s1802_s0 }
  0x18   :  { %p1449_p10 = pnand %p1447_p9, %p1444_p8 }
  0x1a   :  { %1452 = shalt.err (!%p1449_p10)
}
  0x1b   :  { %s1453_s16 = scalar_lea.vmem %s1582_s21, 1024  ;;  %p1458_p12 = scmp.lt.s32.totalorder %s1582_s21, %s1582_s21 }
  0x1c   :  { %p1454_p11 = scmp.ne.s32.totalorder %s1582_s21, %s1453_s16  ;;  %p1459_p13 = scmp.lt.s32.totalorder %s1453_s16, %s1453_s16 }
  0x1e   :  { %p1460_p0 = por %p1459_p13, %p1458_p12 }
  0x20   :  { %p1461_p1 = pnand %p1460_p0, %p1454_p11 }
  0x22   :  { %1464 = shalt.err (!%p1461_p1)
}
  0x23   :  { %26 = dma.hbm_to_vmem [thread:$0]  %s1802_s0, 1024, %s1582_s21, [#allocation6], %s1541_s30, %s1541_s30, %s1542_s6  }
  0x24   :  { %s1543_s18 = smov [#allocation10]   ;;  %s1465_s23 = scalar_lea.hbm %s1804_s2, 512 }
  0x25   :  { %s44_s19 = sshll.u32 %s1543_s18, 4  ;;  %p1466_p2 = scmp.ne.s32.totalorder %s1804_s2, %s1465_s23  ;;  %s45_s19 = int_to_ptr.vmem [resolvable:$true] %s44_s19 }
  0x26   :  { %p1469_p3 = scmp.lt.u32.totalorder %s1465_s23, %s1804_s2 }
  0x28   :  { %p1471_p4 = pnand %p1469_p3, %p1466_p2 }
  0x2a   :  { %1474 = shalt.err (!%p1471_p4)
}
  0x2b   :  { %s1475_s28 = scalar_lea.vmem %s45_s19, 512  ;;  %p1480_p6 = scmp.lt.s32.totalorder %s45_s19, %s45_s19 }
  0x2c   :  { %p1476_p5 = scmp.ne.s32.totalorder %s45_s19, %s1475_s28  ;;  %p1481_p7 = scmp.lt.s32.totalorder %s1475_s28, %s1475_s28 }
  0x2e   :  { %p1482_p8 = por %p1481_p7, %p1480_p6 }
  0x30   :  { %p1483_p9 = pnand %p1482_p8, %p1476_p5 }
  0x32   :  { %1486 = shalt.err (!%p1483_p9)
}
  0x33   :  { %50 = dma.hbm_to_vmem [thread:$0]  %s1804_s2, 512, %s45_s19, [#allocation9], %s1541_s30, %s1541_s30, %s1542_s6  }
  0x34   :  { %1531 = dma.done.wait [#allocation6], 1024  }
  0x35   :  { %1532 = vsyncadd [#allocation6], 4294966272 }
  0x36   :  { %1533 = dma.done.wait [#allocation9], 768  }
  0x37   :  { %1534 = vsyncadd [#allocation9], 4294966528  ;;  %v1544_v0 = vmov 0.0|0.0   ;;  %vm1545_vm0 = vmmov 0   ;;  %v1546_v1 = vmov 0.0   ;;  %vm66_vm1 = vcmask 261120  }
  0x38   :  { %1296 = vmatprep.subr.bf16.mxu1 %v1544_v0  ;;  %1212 = vmatprep.mubr.msk.f32.mxu1 %vm1545_vm0, %v1546_v1  ;;  %67 = vst.msk [vmem:[#allocation3] sm:$0xff] %vm66_vm1, %v1546_v1  ;;  %68 = vst.msk [vmem:[#allocation4] sm:$0xff] %vm66_vm1, %v1546_v1  ;;  %vm86_vm2 = vcmask 130048   ;;  %v77_v2 = vld [vmem:[#allocation8] sm:$0xff]  ;;  %v78_v3 = vld [vmem:[#allocation8 + $0x8] sm:$0xff]  ;;  %s1547_s7 = smov 64  }
  0x39   :  { %v224_v4 = vld [vmem:[#allocation10] sm:$0xff]  ;;  %v1292_v5 = vpack.c.bf16 %v78_v3, %v77_v2  ;;  %v225_v6 = vld [vmem:[#allocation10 + $0x8] sm:$0xff]  ;;  %v69_v7 = vld [vmem:[#allocation5] sm:$0xff]  ;;  %s1548_s8 = smov 32   ;;  %s1550_s9 = smov [#allocation12]  }
  0x3a   :  { %v1641_v8 = vpack.c.bf16 %v225_v6, %v224_v4  ;;  %1192 = vmatprep.mubr.msk.f32.mxu0 %vm86_vm2, %v69_v7  ;;  %v226_v9 = vld [vmem:[#allocation10 + $0x10] sm:$0xff]  ;;  %v227_v10 = vld [vmem:[#allocation10 + $0x18] sm:$0xff]  ;;  %v1666_v14 = vld [vmem:[%s1805_s3] ss:$0 sm:$0xff]  ;;  %s1549_s3 = smov 96   ;;  %s1099_s10 = sshll.u32 %s1550_s9, 4  ;;  %s1100_s10 = int_to_ptr.vmem [resolvable:$true] %s1099_s10 }
  0x3b   :  { %1293 = vmatprep.subr.bf16.mxu0 %v1292_v5  ;;  %v70_v11 = vld [vmem:[#allocation5 + $0x8] sm:$0xff]  ;;  %v1645_v12 = vpack.c.bf16 %v227_v10, %v226_v9  ;;  %v71_v51 = vld [vmem:[#allocation5 + $0x10] sm:$0xff]  ;;  %v72_v52 = vld [vmem:[#allocation5 + $0x18] sm:$0xff]  ;;  %s1487_s11 = scalar_lea.vmem %s1100_s10, 128  ;;  %p1492_p11 = scmp.lt.s32.totalorder %s1100_s10, %s1100_s10 }
  0x3c   :  { %1298 = vmatpush3.bf16.msra.mxu1 %v1641_v8  ;;  %1295 = vmatpush3.bf16.msra.mxu0 %v1292_v5  ;;  %v73_v53 = vld [vmem:[#allocation5 + $0x20] sm:$0xff]  ;;  %v74_v54 = vld [vmem:[#allocation5 + $0x28] sm:$0xff]  ;;  %v75_v55 = vld [vmem:[#allocation5 + $0x30] sm:$0xff]  ;;  %p1488_p10 = scmp.ne.s32.totalorder %s1100_s10, %s1487_s11  ;;  %p1493_p12 = scmp.lt.s32.totalorder %s1487_s11, %s1487_s11 }
  0x3d   :  { %1299 = vmatprep.subr.bf16.mxu1 %v1544_v0  ;;  %1308 = vmatprep.subr.bf16.mxu0 %v1544_v0  ;;  %v76_v56 = vld [vmem:[#allocation5 + $0x38] sm:$0xff] }
  0x3e   :  { %p1494_p13 = por %p1493_p12, %p1492_p11 }
  0x3f   :  { %1193 = vmatmul.mubr.msk.f32.vlgmr.msra.gmra.mrb[0].mxu0 %vm86_vm2, %v70_v11  ;;  %v228_v13 = vld [vmem:[#allocation3] sm:$0xff]  ;;  %v229_v22 = vld [vmem:[#allocation4] sm:$0xff] }
  0x40   :  { %1301 = vmatpush3.bf16.msra.mxu1 %v1645_v12  ;;  %1310 = vmatpush3.bf16.msra.mxu0 %v1641_v8  ;;  %p1495_p0 = pnand %p1494_p13, %p1488_p10 }
  0x41   :  { %1302 = vmatprep.subr.bf16.mxu1 %v1544_v0  ;;  %1311 = vmatprep.subr.bf16.mxu0 %v1544_v0 }
  0x42   :  { %1195 = vmatprep.mubr.msk.f32.mxu0 %vm86_vm2, %v71_v51 }
  0x43   :  { %1213 = vmatmul.mubr.msk.f32.vlgmr.msra.gmra.mrb[0].mxu1 %vm66_vm1, %v228_v13  ;;  %1196 = vmatmul.mubr.msk.f32.gmra.mrb[2].mxu0 %vm86_vm2, %v72_v52 }
  0x44   :  { %1304 = vmatpush3.bf16.msra.mxu1 %v1641_v8  ;;  %1223 = vmatprep.mubr.msk.f32.mxu1 %vm1545_vm0, %v1546_v1 }
  0x45   :  { %1305 = vmatprep.subr.bf16.mxu1 %v1544_v0  ;;  %1313 = vmatpush3.bf16.msra.mxu0 %v1645_v12 }
  0x46   :  { %1320 = vmatprep.subr.bf16.mxu0 %v1544_v0  ;;  %1198 = vmatprep.mubr.msk.f32.mxu0 %vm86_vm2, %v73_v53 }
  0x47   :  { %1199 = vmatmul.mubr.msk.f32.gmra.mrb[4].mxu0 %vm86_vm2, %v74_v54 }
  0x48   :  { %1307 = vmatpush3.bf16.msra.mxu1 %v1645_v12  ;;  %1201 = vmatprep.mubr.msk.f32.mxu0 %vm86_vm2, %v75_v55 }
  0x49   :  { %1314 = vmatprep.subr.bf16.mxu1 %v1544_v0 }
  0x4b   :  { %1202 = vmatmul.mubr.msk.f32.gmra.mrb[6].mxu0 %vm86_vm2, %v76_v56 }
  0x4c   :  { %1234 = vmatprep.mubr.msk.f32.mxu0 %vm1545_vm0, %v1546_v1 }
 0x112   :  { %v1194_v15 = vpop.f32.mrb[0].mxu0 }
 0x113   :  { %v177_v16 = vpop.f32.mrb[1].mxu0  ;;  %v183_v37 = vadd.f32 %v1194_v15, %v1666_v14 }
 0x114   :  { %v178_v17 = vadd.f32 %v1666_v14, %v177_v16 }
 0x116   :  { %v301_v18 = vpop.f32.mrb[0].mxu1  ;;  %v1197_v60 = vpop.f32.mrb[2].mxu0 }
 0x117   :  { %v305_v19 = vadd.f32 %v301_v18, %v178_v17  ;;  %v1214_v20 = vpop.f32.mrb[1].mxu1  ;;  %v187_v61 = vpop.f32.mrb[3].mxu0 }
 0x118   :  { %v188_v5 = vadd.f32 %v1666_v14, %v187_v61 }
 0x119   :  { %1357 = vtanh.f32 %v305_v19  ;;  %v1123_v23 = vmul.f32 -1.442695, %v305_v19 }
 0x11a   :  { %v1695_v62 = vpop.f32.mrb[4].mxu0 }
 0x11b   :  { %1359 = vpow2.f32 %v1123_v23  ;;  %v1697_v63 = vpop.f32.mrb[5].mxu0 }
 0x11e   :  { %v1699_v2 = vpop.f32.mrb[6].mxu0 }
 0x11f   :  { %v1701_v3 = vpop.f32.mrb[7].mxu0 }
 0x123   :  { %v1358_v21 = vpop.eup %1357 }
 0x124   :  { %319 = vrot.lane.b32.xlu0 %v1358_v21, %s1547_s7 }
 0x125   :  { %v1360_v24 = vpop.eup %1359 }
 0x126   :  { %v309_v25 = vadd.f32 1.0, %v1360_v24 }
 0x128   :  { %314 = vrot.lane.b32.xlu0 %v229_v22, %s1548_s8  ;;  %1361 = vrcp.f32 %v309_v25 }
 0x132   :  { %v1362_v26 = vpop.eup %1361 }
 0x196   :  { %v320_v27 = vpop.permute.xlu0 %319 }
 0x197   :  { %v322_v28 = vmul.f32 %v1362_v26, %v320_v27 }
 0x199   :  { %324 = vrot.lane.b32.xlu1 %v322_v28, %s1548_s8 }
 0x19a   :  { %v315_v29 = vpop.permute.xlu0 %314 }
 0x19b   :  { %v317_v30 = vmul.f32 %v1362_v26, %v315_v29 }
 0x20b   :  { %v325_v31 = vpop.permute.xlu1 %324 }
 0x20c   :  { %v327_v32 = vadd.f32 %v325_v31, %v317_v30 }
 0x20e   :  { %1363 = vtanh.f32 %v327_v32 }
 0x218   :  { %v1364_v33 = vpop.eup %1363 }
 0x219   :  { %330 = vrot.lane.b32.xlu1 %v1364_v33, %s1547_s7 }
 0x28b   :  { %v331_v34 = vpop.permute.xlu1 %330 }
 0x28c   :  { %v333_v35 = vmul.f32 %v1362_v26, %v331_v34  ;;  %v193_v26 = vadd.f32 %v1197_v60, %v1666_v14 }
 0x28e   :  { %335 = vrot.lane.b32.xlu0 %v333_v35, %s1548_s8 }
 0x300   :  { %v336_v36 = vpop.permute.xlu0 %335 }
 0x301   :  { %338 = vst.msk [vmem:[#allocation11] sm:$0xff] %vm66_vm1, %v336_v36  ;;  %1224 = vmatmul.mubr.msk.f32.vlgmr.msra.gmra.mrb[2].mxu1 %vm66_vm1, %v336_v36 }
 0x302   :  { %1316 = vmatpush3.bf16.msra.mxu1 %v1641_v8  ;;  %1245 = vmatprep.mubr.msk.f32.mxu1 %vm1545_vm0, %v1546_v1 }
 0x303   :  { %1317 = vmatprep.subr.bf16.mxu1 %v1544_v0 }
 0x306   :  { %1319 = vmatpush3.bf16.msra.mxu1 %v1645_v12 }
 0x307   :  { %1326 = vmatprep.subr.bf16.mxu1 %v1544_v0 }
 0x3d4   :  { %v409_v38 = vpop.f32.mrb[2].mxu1 }
 0x3d5   :  { %v413_v39 = vadd.f32 %v409_v38, %v183_v37  ;;  %v1225_v40 = vpop.f32.mrb[3].mxu1 }
 0x3d7   :  { %1365 = vtanh.f32 %v413_v39  ;;  %v1125_v42 = vmul.f32 -1.442695, %v413_v39 }
 0x3d9   :  { %1367 = vpow2.f32 %v1125_v42 }
 0x3e1   :  { %v1366_v41 = vpop.eup %1365 }
 0x3e2   :  { %423 = vrot.lane.b32.xlu1 %v1366_v41, %s1547_s7 }
 0x3e3   :  { %v1368_v43 = vpop.eup %1367 }
 0x3e4   :  { %v417_v44 = vadd.f32 1.0, %v1368_v43 }
 0x3e6   :  { %1369 = vrcp.f32 %v417_v44  ;;  %v198_v44 = vadd.f32 %v1666_v14, %v1697_v63  ;;  %v203_v63 = vadd.f32 %v1695_v62, %v1666_v14 }
 0x3f0   :  { %v1370_v45 = vpop.eup %1369 }
 0x3f1   :  { %v421_v48 = vmul.f32 %v1370_v45, %v327_v32 }
 0x454   :  { %v424_v46 = vpop.permute.xlu1 %423 }
 0x455   :  { %v426_v47 = vmul.f32 %v1370_v45, %v424_v46 }
 0x457   :  { %428 = vrot.lane.b32.xlu0 %v426_v47, %s1548_s8 }
 0x4c9   :  { %v429_v49 = vpop.permute.xlu0 %428 }
 0x4ca   :  { %v431_v50 = vadd.f32 %v429_v49, %v421_v48 }
 0x4cc   :  { %1371 = vtanh.f32 %v431_v50 }
 0x4d6   :  { %v1372_v57 = vpop.eup %1371 }
 0x4d7   :  { %434 = vrot.lane.b32.xlu1 %v1372_v57, %s1547_s7 }
 0x549   :  { %v435_v58 = vpop.permute.xlu1 %434 }
 0x54a   :  { %v437_v59 = vmul.f32 %v1370_v45, %v435_v58 }
 0x54c   :  { %439 = vrot.lane.b32.xlu0 %v437_v59, %s1548_s8 }
 0x5be   :  { %v440_v4 = vpop.permute.xlu0 %439 }
 0x5bf   :  { %443 = vst.msk [vmem:[#allocation11 + $0x8] sm:$0xff] %vm66_vm1, %v440_v4  ;;  %1235 = vmatmul.mubr.msk.f32.vlgmr.msra.gmra.mrb[8].mxu0 %vm66_vm1, %v440_v4 }
 0x5c0   :  { %1322 = vmatpush3.bf16.msra.mxu0 %v1641_v8  ;;  %1256 = vmatprep.mubr.msk.f32.mxu0 %vm1545_vm0, %v1546_v1 }
 0x5c1   :  { %1323 = vmatprep.subr.bf16.mxu0 %v1544_v0 }
 0x5c4   :  { %1325 = vmatpush3.bf16.msra.mxu0 %v1645_v12 }
 0x5c5   :  { %1332 = vmatprep.subr.bf16.mxu0 %v1544_v0 }
 0x692   :  { %v514_v6 = vpop.f32.mrb[8].mxu0 }
 0x693   :  { %v518_v7 = vadd.f32 %v514_v6, %v188_v5  ;;  %v1236_v9 = vpop.f32.mrb[9].mxu0 }
 0x695   :  { %1373 = vtanh.f32 %v518_v7  ;;  %v1127_v11 = vmul.f32 -1.442695, %v518_v7 }
 0x697   :  { %1375 = vpow2.f32 %v1127_v11 }
 0x69f   :  { %v1374_v10 = vpop.eup %1373 }
 0x6a0   :  { %528 = vrot.lane.b32.xlu1 %v1374_v10, %s1547_s7 }
 0x6a1   :  { %v1376_v13 = vpop.eup %1375 }
 0x6a2   :  { %v522_v15 = vadd.f32 1.0, %v1376_v13 }
 0x6a4   :  { %1377 = vrcp.f32 %v522_v15 }
 0x6ae   :  { %v1378_v16 = vpop.eup %1377 }
 0x6af   :  { %v526_v19 = vmul.f32 %v1378_v16, %v431_v50 }
 0x712   :  { %v529_v17 = vpop.permute.xlu1 %528 }
 0x713   :  { %v531_v18 = vmul.f32 %v1378_v16, %v529_v17 }
 0x715   :  { %533 = vrot.lane.b32.xlu0 %v531_v18, %s1548_s8 }
 0x787   :  { %v534_v20 = vpop.permute.xlu0 %533 }
 0x788   :  { %v536_v21 = vadd.f32 %v534_v20, %v526_v19  ;;  %v208_v19 = vadd.f32 %v1666_v14, %v1701_v3 }
 0x78a   :  { %1379 = vtanh.f32 %v536_v21 }
 0x794   :  { %v1380_v22 = vpop.eup %1379 }
 0x795   :  { %539 = vrot.lane.b32.xlu1 %v1380_v22, %s1547_s7 }
 0x807   :  { %v540_v23 = vpop.permute.xlu1 %539 }
 0x808   :  { %v542_v24 = vmul.f32 %v1378_v16, %v540_v23 }
 0x80a   :  { %544 = vrot.lane.b32.xlu0 %v542_v24, %s1548_s8 }
 0x87c   :  { %v545_v25 = vpop.permute.xlu0 %544 }
 0x87d   :  { %548 = vst.msk [vmem:[#allocation11 + $0x10] sm:$0xff] %vm66_vm1, %v545_v25  ;;  %1246 = vmatmul.mubr.msk.f32.vlgmr.msra.gmra.mrb[4].mxu1 %vm66_vm1, %v545_v25 }
 0x87e   :  { %1328 = vmatpush3.bf16.msra.mxu1 %v1641_v8  ;;  %1267 = vmatprep.mubr.msk.f32.mxu1 %vm1545_vm0, %v1546_v1 }
 0x87f   :  { %1329 = vmatprep.subr.bf16.mxu1 %v1544_v0 }
 0x882   :  { %1331 = vmatpush3.bf16.msra.mxu1 %v1645_v12 }
 0x883   :  { %1338 = vmatprep.subr.bf16.mxu1 %v1544_v0 }
 0x950   :  { %v619_v27 = vpop.f32.mrb[4].mxu1 }
 0x951   :  { %v623_v28 = vadd.f32 %v619_v27, %v193_v26  ;;  %v1247_v29 = vpop.f32.mrb[5].mxu1 }
 0x953   :  { %1381 = vtanh.f32 %v623_v28  ;;  %v1129_v31 = vmul.f32 -1.442695, %v623_v28 }
 0x955   :  { %1383 = vpow2.f32 %v1129_v31 }
 0x95d   :  { %v1382_v30 = vpop.eup %1381 }
 0x95e   :  { %633 = vrot.lane.b32.xlu1 %v1382_v30, %s1547_s7 }
 0x95f   :  { %v1384_v32 = vpop.eup %1383 }
 0x960   :  { %v627_v33 = vadd.f32 1.0, %v1384_v32 }
 0x962   :  { %1385 = vrcp.f32 %v627_v33 }
 0x96c   :  { %v1386_v34 = vpop.eup %1385 }
 0x96d   :  { %v631_v37 = vmul.f32 %v1386_v34, %v536_v21 }
 0x9d0   :  { %v634_v35 = vpop.permute.xlu1 %633 }
 0x9d1   :  { %v636_v36 = vmul.f32 %v1386_v34, %v634_v35 }
 0x9d3   :  { %638 = vrot.lane.b32.xlu0 %v636_v36, %s1548_s8  ;;  %v213_v36 = vadd.f32 %v1699_v2, %v1666_v14 }
 0xa45   :  { %v639_v38 = vpop.permute.xlu0 %638 }
 0xa46   :  { %v641_v39 = vadd.f32 %v639_v38, %v631_v37 }
 0xa48   :  { %1387 = vtanh.f32 %v641_v39 }
 0xa52   :  { %v1388_v40 = vpop.eup %1387 }
 0xa53   :  { %644 = vrot.lane.b32.xlu1 %v1388_v40, %s1547_s7 }
 0xac5   :  { %v645_v41 = vpop.permute.xlu1 %644 }
 0xac6   :  { %v647_v42 = vmul.f32 %v1386_v34, %v645_v41 }
 0xac8   :  { %649 = vrot.lane.b32.xlu0 %v647_v42, %s1548_s8 }
 0xb3a   :  { %v650_v43 = vpop.permute.xlu0 %649 }
 0xb3b   :  { %653 = vst.msk [vmem:[#allocation11 + $0x18] sm:$0xff] %vm66_vm1, %v650_v43  ;;  %1257 = vmatmul.mubr.msk.f32.vlgmr.msra.gmra.mrb[10].mxu0 %vm66_vm1, %v650_v43 }
 0xb3c   :  { %1334 = vmatpush3.bf16.msra.mxu0 %v1641_v8  ;;  %1278 = vmatprep.mubr.msk.f32.mxu0 %vm1545_vm0, %v1546_v1 }
 0xb3d   :  { %1335 = vmatprep.subr.bf16.mxu0 %v1544_v0 }
 0xb40   :  { %1337 = vmatpush3.bf16.msra.mxu0 %v1645_v12 }
 0xc0e   :  { %v724_v45 = vpop.f32.mrb[10].mxu0 }
 0xc0f   :  { %v728_v46 = vadd.f32 %v724_v45, %v198_v44  ;;  %v1258_v47 = vpop.f32.mrb[11].mxu0 }
 0xc11   :  { %1389 = vtanh.f32 %v728_v46  ;;  %v1131_v49 = vmul.f32 -1.442695, %v728_v46 }
 0xc13   :  { %1391 = vpow2.f32 %v1131_v49 }
 0xc1b   :  { %v1390_v48 = vpop.eup %1389 }
 0xc1c   :  { %738 = vrot.lane.b32.xlu1 %v1390_v48, %s1547_s7 }
 0xc1d   :  { %v1392_v50 = vpop.eup %1391 }
 0xc1e   :  { %v732_v51 = vadd.f32 1.0, %v1392_v50 }
 0xc20   :  { %1393 = vrcp.f32 %v732_v51 }
 0xc2a   :  { %v1394_v52 = vpop.eup %1393 }
 0xc2b   :  { %v736_v55 = vmul.f32 %v1394_v52, %v641_v39 }
 0xc8e   :  { %v739_v53 = vpop.permute.xlu1 %738 }
 0xc8f   :  { %v741_v54 = vmul.f32 %v1394_v52, %v739_v53 }
 0xc91   :  { %743 = vrot.lane.b32.xlu0 %v741_v54, %s1548_s8 }
 0xd03   :  { %v744_v56 = vpop.permute.xlu0 %743 }
 0xd04   :  { %v746_v57 = vadd.f32 %v744_v56, %v736_v55 }
 0xd06   :  { %1395 = vtanh.f32 %v746_v57 }
 0xd10   :  { %v1396_v58 = vpop.eup %1395 }
 0xd11   :  { %749 = vrot.lane.b32.xlu1 %v1396_v58, %s1547_s7 }
 0xd83   :  { %v750_v59 = vpop.permute.xlu1 %749 }
 0xd84   :  { %v752_v60 = vmul.f32 %v1394_v52, %v750_v59 }
 0xd86   :  { %754 = vrot.lane.b32.xlu0 %v752_v60, %s1548_s8 }
 0xdf8   :  { %v755_v61 = vpop.permute.xlu0 %754 }
 0xdf9   :  { %758 = vst.msk [vmem:[#allocation11 + $0x20] sm:$0xff] %vm66_vm1, %v755_v61  ;;  %1268 = vmatmul.mubr.msk.f32.vlgmr.msra.gmra.mrb[6].mxu1 %vm66_vm1, %v755_v61 }
 0xdfa   :  { %1340 = vmatpush3.bf16.msra.mxu1 %v1641_v8  ;;  %1289 = vmatprep.mubr.msk.f32.mxu1 %vm1545_vm0, %v1546_v1 }
 0xdfb   :  { %1341 = vmatprep.subr.bf16.mxu1 %v1544_v0 }
 0xdfe   :  { %1343 = vmatpush3.bf16.msra.mxu1 %v1645_v12 }
 0xecc   :  { %v829_v4 = vpop.f32.mrb[6].mxu1 }
 0xecd   :  { %v833_v5 = vadd.f32 %v829_v4, %v203_v63  ;;  %v1269_v6 = vpop.f32.mrb[7].mxu1 }
 0xecf   :  { %1397 = vtanh.f32 %v833_v5  ;;  %v1133_v9 = vmul.f32 -1.442695, %v833_v5 }
 0xed1   :  { %1399 = vpow2.f32 %v1133_v9 }
 0xed9   :  { %v1398_v7 = vpop.eup %1397 }
 0xeda   :  { %843 = vrot.lane.b32.xlu1 %v1398_v7, %s1547_s7 }
 0xedb   :  { %v1400_v8 = vpop.eup %1399 }
 0xedc   :  { %v837_v10 = vadd.f32 1.0, %v1400_v8 }
 0xede   :  { %1401 = vrcp.f32 %v837_v10 }
 0xee8   :  { %v1402_v1 = vpop.eup %1401 }
 0xee9   :  { %v841_v12 = vmul.f32 %v1402_v1, %v746_v57 }
 0xf4c   :  { %v844_v11 = vpop.permute.xlu1 %843 }
 0xf4d   :  { %v846_v0 = vmul.f32 %v1402_v1, %v844_v11 }
 0xf4f   :  { %848 = vrot.lane.b32.xlu0 %v846_v0, %s1548_s8 }
 0xfc1   :  { %v849_v13 = vpop.permute.xlu0 %848 }
 0xfc2   :  { %v851_v62 = vadd.f32 %v849_v13, %v841_v12 }
 0xfc4   :  { %1403 = vtanh.f32 %v851_v62 }
 0xfce   :  { %v1404_v15 = vpop.eup %1403 }
 0xfcf   :  { %854 = vrot.lane.b32.xlu1 %v1404_v15, %s1547_s7 }
0x1041   :  { %v855_v16 = vpop.permute.xlu1 %854 }
0x1042   :  { %v857_v17 = vmul.f32 %v1402_v1, %v855_v16 }
0x1044   :  { %859 = vrot.lane.b32.xlu0 %v857_v17, %s1548_s8 }
0x10b6   :  { %v860_v18 = vpop.permute.xlu0 %859 }
0x10b7   :  { %863 = vst.msk [vmem:[#allocation11 + $0x28] sm:$0xff] %vm66_vm1, %v860_v18  ;;  %1279 = vmatmul.mubr.msk.f32.vlgmr.msra.gmra.mrb[12].mxu0 %vm66_vm1, %v860_v18 }
0x118a   :  { %v934_v20 = vpop.f32.mrb[12].mxu0 }
0x118b   :  { %v938_v21 = vadd.f32 %v934_v20, %v208_v19  ;;  %v1280_v22 = vpop.f32.mrb[13].mxu0 }
0x118d   :  { %1405 = vtanh.f32 %v938_v21  ;;  %v1135_v24 = vmul.f32 -1.442695, %v938_v21 }
0x118f   :  { %1407 = vpow2.f32 %v1135_v24 }
0x1197   :  { %v1406_v23 = vpop.eup %1405 }
0x1198   :  { %948 = vrot.lane.b32.xlu1 %v1406_v23, %s1547_s7 }
0x1199   :  { %v1408_v25 = vpop.eup %1407 }
0x119a   :  { %v942_v26 = vadd.f32 1.0, %v1408_v25 }
0x119c   :  { %1409 = vrcp.f32 %v942_v26 }
0x11a6   :  { %v1410_v27 = vpop.eup %1409 }
0x11a7   :  { %v946_v30 = vmul.f32 %v1410_v27, %v851_v62 }
0x120a   :  { %v949_v28 = vpop.permute.xlu1 %948 }
0x120b   :  { %v951_v29 = vmul.f32 %v1410_v27, %v949_v28 }
0x120d   :  { %953 = vrot.lane.b32.xlu0 %v951_v29, %s1548_s8 }
0x127f   :  { %v954_v31 = vpop.permute.xlu0 %953 }
0x1280   :  { %v956_v3 = vadd.f32 %v954_v31, %v946_v30 }
0x1282   :  { %1411 = vtanh.f32 %v956_v3 }
0x128c   :  { %v1412_v32 = vpop.eup %1411 }
0x128d   :  { %959 = vrot.lane.b32.xlu1 %v1412_v32, %s1547_s7 }
0x12ff   :  { %v960_v33 = vpop.permute.xlu1 %959 }
0x1300   :  { %v962_v34 = vmul.f32 %v1410_v27, %v960_v33 }
0x1302   :  { %964 = vrot.lane.b32.xlu0 %v962_v34, %s1548_s8 }
0x1374   :  { %v965_v35 = vpop.permute.xlu0 %964 }
0x1375   :  { %968 = vst.msk [vmem:[#allocation11 + $0x30] sm:$0xff] %vm66_vm1, %v965_v35  ;;  %1290 = vmatmul.mubr.msk.f32.vlgmr.msra.gmra.mrb[8].mxu1 %vm66_vm1, %v965_v35 }
0x1448   :  { %v1039_v37 = vpop.f32.mrb[8].mxu1 }
0x1449   :  { %v1043_v38 = vadd.f32 %v1039_v37, %v213_v36  ;;  %v1291_v39 = vpop.f32.mrb[9].mxu1 }
0x144b   :  { %1413 = vtanh.f32 %v1043_v38  ;;  %v1137_v41 = vmul.f32 -1.442695, %v1043_v38 }
0x144d   :  { %1415 = vpow2.f32 %v1137_v41 }
0x1455   :  { %v1414_v40 = vpop.eup %1413 }
0x1456   :  { %1053 = vrot.lane.b32.xlu1 %v1414_v40, %s1547_s7 }
0x1457   :  { %v1416_v42 = vpop.eup %1415 }
0x1458   :  { %v1047_v43 = vadd.f32 1.0, %v1416_v42 }
0x145a   :  { %1417 = vrcp.f32 %v1047_v43 }
0x1464   :  { %v1418_v44 = vpop.eup %1417 }
0x1465   :  { %v1051_v47 = vmul.f32 %v1418_v44, %v956_v3 }
0x14c8   :  { %v1054_v45 = vpop.permute.xlu1 %1053 }
0x14c9   :  { %v1056_v46 = vmul.f32 %v1418_v44, %v1054_v45 }
0x14cb   :  { %1058 = vrot.lane.b32.xlu0 %v1056_v46, %s1548_s8 }
0x153d   :  { %v1059_v48 = vpop.permute.xlu0 %1058 }
0x153e   :  { %v1061_v14 = vadd.f32 %v1059_v48, %v1051_v47 }
0x1540   :  { %1419 = vtanh.f32 %v1061_v14 }
0x154a   :  { %v1420_v2 = vpop.eup %1419 }
0x154b   :  { %1064 = vrot.lane.b32.xlu1 %v1420_v2, %s1547_s7 }
0x154f   :  { %1076 = vrot.lane.b32.xlu1 %v1061_v14, %s1549_s3 }
0x15bd   :  { %v1065_v49 = vpop.permute.xlu1 %1064 }
0x15be   :  { %v1067_v50 = vmul.f32 %v1418_v44, %v1065_v49 }
0x15c0   :  { %1069 = vrot.lane.b32.xlu0 %v1067_v50, %s1548_s8 }
0x15c1   :  { %v1077_v51 = vpop.permute.xlu1 %1076 }
0x15c2   :  { %1079 = vst.msk [vmem:[#allocation4] sm:$0xff] %vm66_vm1, %v1077_v51  ;;  %1080 = vst.msk [vmem:[#allocation12] sm:$0xff] %vm66_vm1, %v1077_v51 }
0x15c3   :  { %1498 = shalt.err (!%p1495_p0)
}
0x15c4   :  { %s1499_s14 = scalar_lea.hbm %s1807_s5, 128 }
0x15c5   :  { %p1500_p1 = scmp.ne.s32.totalorder %s1807_s5, %s1499_s14  ;;  %p1503_p2 = scmp.lt.u32.totalorder %s1499_s14, %s1807_s5 }
0x15c7   :  { %p1505_p3 = pnand %p1503_p2, %p1500_p1 }
0x15c9   :  { %1508 = shalt.err (!%p1505_p3)
}
0x15ca   :  { %1102 = dma.vmem_to_hbm [thread:$0]  %s1100_s10, 128, %s1807_s5, [#allocation13]  }
0x15cb   :  { %s1551_s20 = smov [#allocation11]  }
0x15cc   :  { %s1086_s22 = sshll.u32 %s1551_s20, 4  ;;  %s1087_s22 = int_to_ptr.vmem [resolvable:$true] %s1086_s22 }
0x15cd   :  { %s1509_s23 = scalar_lea.vmem %s1087_s22, 1024  ;;  %p1514_p5 = scmp.lt.s32.totalorder %s1087_s22, %s1087_s22 }
0x15ce   :  { %p1510_p4 = scmp.ne.s32.totalorder %s1087_s22, %s1509_s23  ;;  %p1515_p6 = scmp.lt.s32.totalorder %s1509_s23, %s1509_s23 }
0x15d0   :  { %p1516_p7 = por %p1515_p6, %p1514_p5 }
0x15d2   :  { %p1517_p8 = pnand %p1516_p7, %p1510_p4 }
0x1632   :  { %v1070_v52 = vpop.permute.xlu0 %1069 }
0x1633   :  { %1073 = vst.msk [vmem:[#allocation11 + $0x38] sm:$0xff] %vm66_vm1, %v1070_v52  ;;  %1074 = vst.msk [vmem:[#allocation3] sm:$0xff] %vm66_vm1, %v1070_v52 }
0x1634   :  { %1520 = shalt.err (!%p1517_p8)
}
0x1635   :  { %s1521_s26 = scalar_lea.hbm %s1806_s4, 1024 }
0x1636   :  { %p1522_p9 = scmp.ne.s32.totalorder %s1806_s4, %s1521_s26  ;;  %p1525_p10 = scmp.lt.u32.totalorder %s1521_s26, %s1806_s4 }
0x1638   :  { %p1527_p11 = pnand %p1525_p10, %p1522_p9 }
0x163a   :  { %1530 = shalt.err (!%p1527_p11)
}
0x163b   :  { %1092 = dma.vmem_to_hbm [thread:$0]  %s1087_s22, 1024, %s1806_s4, [#allocation7], %s1541_s30, %s1541_s30, %s1542_s6  }
0x163c   :  { %1535 = dma.done.wait [#allocation7], 1024  }
0x163d   :  { %1536 = vsyncadd [#allocation7], 4294966272 }
0x163e   :  { %1537 = dma.done.wait [#allocation13], 128  }
0x163f   :  { %1538 = vsyncadd [#allocation13], 4294967168 }
0x1640   :  { %1109 = vsyncpa [#allocation6], 1 }
0x1641   :  { %1110 = vsyncpa [#allocation9], 1 }
0x1642   :  { %1111 = vsyncpa [#allocation7], 1 }
0x1643   :  { %1112 = vsyncpa [#allocation13], 1 }

</bundles_post_ra>
